<compile_context>
chip_gen: v7x
topology: tpu7x:2x2x1
jax: 0.10.0
libtpu: 0.0.40
codegen_flags: <defaults>
</compile_context>

<pallas_src>
import math

import jax
import jax.numpy as jnp
from jax.experimental import pallas as pl
from jax.experimental.pallas import tpu as pltpu


# ---------------------------------------------------------------------------
# Hardware / budget helpers
# ---------------------------------------------------------------------------

def _vmem_capacity_bytes():
    """Physical VMEM of the local chip (128 MiB v5e/v6e, 64 MiB v7x)."""
    try:
        info = pltpu.get_tpu_info()
        cap = getattr(info, "vmem_capacity_bytes", None)
        if cap:
            return int(cap)
    except Exception:
        pass
    return 128 * 1024 * 1024


def _per_buffer_budget(cap):
    # Input + output, each double-buffered -> 4 live buffers; keep one buffer to
    # ~1/16 of physical VMEM (8 MiB on v5e/v6e, 4 MiB on v7x) so there is
    # headroom for Mosaic scratch and the pipeline never loses double-buffering.
    return max(cap // 16, 1 << 20)


def _sublane_multiple(dtype):
    # Sub-32-bit dtypes pack along sublanes: 8 rows for f32, 16 for bf16,
    # 32 for int8/fp8.  Keeping tiles at the packing multiple avoids
    # unpack/repack relayouts on the VALU.
    isz = jnp.dtype(dtype).itemsize
    return max(8, 32 // max(isz, 1))


def _pick_tile(dim, multiples, cap):
    """Largest divisor of `dim` that is <= cap and a multiple of one of
    `multiples` (tried in preference order).  Full extent — always layout
    legal — is used when dim <= cap, and as a last resort."""
    if dim <= cap:
        return dim
    for m in multiples:
        t = (cap // m) * m
        while t >= m:
            if dim % t == 0:
                return t
            t -= m
    return dim


def _compiler_params(n_axes, block_bytes, cap):
    # Every grid axis is independent (pure permutation, no reduction).
    # TODO(synk): on v7x, promoting the largest axis to pltpu.CORE_PARALLEL (or
    # an explicit core_map) can roughly double delivered HBM bandwidth for this
    # mem-bound kernel; kept at "parallel" here for portability across v5e/v6e.
    needed = 4 * block_bytes + (8 << 20)          # 2x in + 2x out + headroom
    limit = int(min(max(needed, 32 << 20), cap * 3 // 4))
    return pltpu.CompilerParams(
        dimension_semantics=("parallel",) * n_axes,
        vmem_limit_bytes=limit,
    )


# ---------------------------------------------------------------------------
# Kernels
# ---------------------------------------------------------------------------

def _copy_kernel(x_ref, o_ref):
    # Pure copy: the permutation is expressed entirely by the output BlockSpec
    # index_map (both swapped dims are non-minor). Lane-dense load and store.
    o_ref[...] = x_ref[...]


def _minor_transpose_kernel(x_ref, o_ref):
    # 2-D (tr, tc) tile -> (tc, tr) tile on the XLU transpose unit.
    o_ref[...] = x_ref[...].T


# ---------------------------------------------------------------------------
# Paths
# ---------------------------------------------------------------------------

def _leading_swap(x, d0, d1):
    """Swap of two dims, neither of which is one of the two minor dims."""
    n = x.ndim
    shape = x.shape
    out_shape = list(shape)
    out_shape[d0], out_shape[d1] = out_shape[d1], out_shape[d0]
    out_sds = jax.ShapeDtypeStruct(tuple(out_shape), x.dtype)

    isz = jnp.dtype(x.dtype).itemsize
    cap = _vmem_capacity_bytes()
    budget = _per_buffer_budget(cap)
    sub = _sublane_multiple(x.dtype)

    fold_from = d1 + 1                       # trailing dims that never move
    fold_elems = math.prod(shape[fold_from:])

    if fold_elems * isz <= budget:
        # Fold every trailing dim (incl. both minor dims) into one block: each
        # grid step is one fully contiguous HBM slab on both sides.
        grid = shape[:fold_from]
        blk = (None,) * fold_from + tuple(shape[fold_from:])
        block_bytes = fold_elems * isz
        n_trailing = n - fold_from

        def in_map(*g):
            return tuple(g) + (0,) * n_trailing

        def out_map(*g):
            g = list(g)
            g[d0], g[d1] = g[d1], g[d0]
            return tuple(g) + (0,) * n_trailing
    else:
        # Too big to fold everything: keep dims d1+1..n-3 as grid axes and tile
        # the minor two dims under the budget, keeping rows as wide as possible
        # (full / 128-multiple last dim -> contiguous DMAs, unmasked stores).
        R, C = shape[-2], shape[-1]
        tc = _pick_tile(C, (128,), max(128, budget // (isz * sub)))
        tr = _pick_tile(R, (sub,), max(sub, budget // (isz * tc)))
        grid = shape[: n - 2] + (R // tr, C // tc)
        blk = (None,) * (n - 2) + (tr, tc)
        block_bytes = tr * tc * isz

        def in_map(*g):
            return g

        def out_map(*g):
            g = list(g)
            g[d0], g[d1] = g[d1], g[d0]
            return tuple(g)

    # TODO(synk): when this feeds another Pallas kernel, absorbing the leading
    # permutation into the consumer's index_map avoids this HBM read+write pass
    # entirely; as a standalone module it must materialize the copy.
    return pl.pallas_call(
        _copy_kernel,
        out_shape=out_sds,
        grid=grid,
        in_specs=[pl.BlockSpec(blk, in_map)],
        out_specs=pl.BlockSpec(blk, out_map),
        compiler_params=_compiler_params(len(grid), block_bytes, cap),
    )(x)


def _minor_swap(x):
    """Swap of the last two dims: tiled transpose on the XLU."""
    n = x.ndim
    shape = x.shape
    R, C = shape[-2], shape[-1]
    out_sds = jax.ShapeDtypeStruct(shape[:-2] + (C, R), x.dtype)

    isz = jnp.dtype(x.dtype).itemsize
    cap = _vmem_capacity_bytes()
    budget = _per_buffer_budget(cap)
    sub = _sublane_multiple(x.dtype)

    # Square-ish tiles; prefer multiples of 128 on BOTH axes so loads and the
    # transposed stores stay unmasked, with the dtype packing multiple as a
    # fallback.  cap_dim^2 * itemsize stays within the per-buffer budget.
    cap_dim = max(128, (math.isqrt(budget // isz) // 128) * 128)
    tr = _pick_tile(R, (128, sub), cap_dim)   # input sublane / output lane dim
    tc = _pick_tile(C, (128, sub), cap_dim)   # input lane / output sublane dim
    # NOTE: if R < 128 the output's last dim is < 128 and stores are necessarily
    # masked; only fusing the transpose into the consumer avoids that.

    n_lead = n - 2
    # Grid order: the input-sublane tile index iterates fastest so consecutive
    # grid steps write consecutive output blocks (sequential HBM writeback).
    grid = shape[:n_lead] + (C // tc, R // tr)
    in_blk = (None,) * n_lead + (tr, tc)
    out_blk = (None,) * n_lead + (tc, tr)

    def in_map(*g):
        return g[:n_lead] + (g[n_lead + 1], g[n_lead])

    def out_map(*g):
        return g[:n_lead] + (g[n_lead], g[n_lead + 1])

    return pl.pallas_call(
        _minor_transpose_kernel,
        out_shape=out_sds,
        grid=grid,
        in_specs=[pl.BlockSpec(in_blk, in_map)],
        out_specs=pl.BlockSpec(out_blk, out_map),
        compiler_params=_compiler_params(len(grid), tr * tc * isz, cap),
    )(x)


# ---------------------------------------------------------------------------
# Public wrapper (mirrors TransposeNorm.forward)
# ---------------------------------------------------------------------------

def transpose_norm(x, dim0, dim1):
    """Pallas implementation of TransposeNorm(dim0, dim1).forward(x)."""
    n = x.ndim
    # PyTorch guard: dims out of range -> identity (return the input as-is).
    if max(dim0, dim1) >= n:
        return x
    a, b = dim0 % n, dim1 % n
    if a == b:
        return x
    d0, d1 = (a, b) if a < b else (b, a)

    if d0 == n - 2 and d1 == n - 1:
        return _minor_swap(x)
    if d1 < n - 2:
        return _leading_swap(x, d0, d1)

    # TODO(synk): a swap between a leading dim and one of the two minor dims
    # needs a general N-D transpose that Mosaic does not lower cleanly (and a
    # doc-legal BlockSpec forces a size-1 second-minor block on one side); left
    # to XLA's transpose instead of an unbounded-VMEM Pallas block.
    return jnp.swapaxes(x, d0, d1)


def transpose_norm_reference(x, dim0, dim1):
    """Plain-JAX reference mirroring the PyTorch forward."""
    if max(dim0, dim1) < x.ndim:
        return jnp.swapaxes(x, dim0, dim1)
    return x


# ---------------------------------------------------------------------------
# Demo / self-test
# ---------------------------------------------------------------------------

if __name__ == "__main__":
    key = jax.random.PRNGKey(0)
    k1, k2 = jax.random.split(key)

    # Case 1: canonical (B, T, C) -> (B, C, T): minor-2 swap on 3-D input.
    x3 = jax.random.normal(k1, (2, 8, 128), jnp.float32)
    y1 = jax.block_until_ready(transpose_norm(x3, 1, 2))
    assert y1.shape == (2, 128, 8), y1.shape
    assert jnp.array_equal(y1, transpose_norm_reference(x3, 1, 2)), "case 1 mismatch"

    # Case 2: 4-D minor-2 swap.
    x4 = jax.random.normal(k2, (2, 4, 16, 128), jnp.float32)
    y2 = jax.block_until_ready(transpose_norm(x4, 2, 3))
    assert y2.shape == (2, 4, 128, 16), y2.shape
    assert jnp.array_equal(y2, transpose_norm_reference(x4, 2, 3)), "case 2 mismatch"

    # Case 3: leading-dim swap -> copy kernel, permutation only in the output
    # index_map, all trailing dims folded into one contiguous block per step.
    y3 = jax.block_until_ready(transpose_norm(x4, 0, 1))
    assert y3.shape == (4, 2, 16, 128), y3.shape
    assert jnp.array_equal(y3, transpose_norm_reference(x4, 0, 1)), "case 3 mismatch"

    # Case 4: bf16 leading swap exercises the dtype-aware (16-row) packing path.
    xb = jax.random.normal(k1, (4, 2, 32, 128), jnp.float32).astype(jnp.bfloat16)
    y4 = jax.block_until_ready(transpose_norm(xb, 0, 1))
    assert y4.shape == (2, 4, 32, 128), y4.shape
    assert jnp.array_equal(y4, transpose_norm_reference(xb, 0, 1)), "case 4 mismatch"

    # Case 5: swap of a leading dim with a minor dim -> bounded XLA fallback.
    y5 = jax.block_until_ready(transpose_norm(x4, 1, 3))
    assert y5.shape == (2, 128, 16, 4), y5.shape
    assert jnp.array_equal(y5, transpose_norm_reference(x4, 1, 3)), "case 5 mismatch"

    # Case 6: out-of-range dims -> identity, matching the PyTorch guard.
    y6 = jax.block_until_ready(transpose_norm(x4, 4, 5))
    assert jnp.array_equal(y6, x4), "case 6 mismatch"

    print("KERNEL_OK")
</pallas_src>

<mosaic_0001>
module attributes {stable_mosaic.version = 11 : i64} {
  func.func @_minor_transpose_kernel(%arg0: i32, %arg1: i32, %arg2: i32, %arg3: memref<1x8x128xf32, #tpu.memory_space<vmem>>, %arg4: memref<1x128x8xf32, #tpu.memory_space<vmem>>) attributes {dimension_semantics = [#tpu.dimension_semantics<parallel>, #tpu.dimension_semantics<parallel>, #tpu.dimension_semantics<parallel>], iteration_bounds = array<i64: 2, 1, 1>, scalar_prefetch = 0 : i64, scratch_operands = 0 : i64, tpu.core_type = #tpu.core_type<tc>, window_params = [{transform_indices = @transform_0, window_bounds = array<i64: 1, 8, 128>}, {transform_indices = @transform_1, window_bounds = array<i64: 1, 128, 8>}]} {
    %c0 = arith.constant 0 : index
    %c0_0 = arith.constant 0 : index
    %c0_1 = arith.constant 0 : index
    %0 = vector.load %arg3[%c0, %c0_0, %c0_1] : memref<1x8x128xf32, #tpu.memory_space<vmem>>, vector<1x8x128xf32>
    %1 = vector.shape_cast %0 : vector<1x8x128xf32> to vector<8x128xf32>
    %2 = tpu.transpose %1, [1, 0] : vector<8x128xf32> -> vector<128x8xf32>
    %c0_2 = arith.constant 0 : index
    %c0_3 = arith.constant 0 : index
    %c0_4 = arith.constant 0 : index
    %3 = vector.load %arg4[%c0_2, %c0_3, %c0_4] : memref<1x128x8xf32, #tpu.memory_space<vmem>>, vector<1x128x8xf32>
    %4 = vector.shape_cast %3 : vector<1x128x8xf32> to vector<128x8xf32>
    %5 = vector.shape_cast %2 : vector<128x8xf32> to vector<1x128x8xf32>
    tpu.vector_store %arg4[%c0_2, %c0_3, %c0_4], %5 {strides = array<i32>} : memref<1x128x8xf32, #tpu.memory_space<vmem>>, vector<1x128x8xf32>,
    return
  }
  func.func @transform_0(%arg0: i32, %arg1: i32, %arg2: i32) -> (i32, i32, i32) {
    %c0_i32 = arith.constant 0 : i32
    return %arg0, %arg2, %arg1 : i32, i32, i32
  }
  func.func @transform_1(%arg0: i32, %arg1: i32, %arg2: i32) -> (i32, i32, i32) {
    %c0_i32 = arith.constant 0 : i32
    return %arg0, %arg1, %arg2 : i32, i32, i32
  }
}

</mosaic_0001>

<bundles_post_ra>
// kernel: tpu_custom_call.1
= control target key start
LH: loop header
LB: loop body
LE: loop exit
PB: predicated region body
PF: predicated region fallthrough
CT: control target
= control target key end

     0   :  { %6 = vsyncpa [#allocation3], 0  ;;  %s656_s0 = inlined_call_operand.hbm [shape: f32[2,8,128], index: 0, kind: input, shape index: {}]   ;;  %s657_s1 = inlined_call_operand.vmem [shape: f32[2,128,8], index: 1, kind: output, shape index: {}]  }
   0x1   :  { %8 = vsyncpa [#allocation3 + $0x1], 0  ;;  %s497_s6 = smov 0   ;;  %s499_s7 = smov 0  }
   0x2   :  { %s501_s8 = smov 0   ;;  %s503_s9 = smov 0  }
   0x3   :  { %s505_s10 = smov 0   ;;  %s507_s11 = smov 0  }
   0x4 LB: > { %s335_s12 = sadd.s32 4294967295, %s484_s11   ;;  %s33_s13 = sadd.s32 1, %s480_s10  ;;  %s484_s11 = sphi %s507_s11, %s14_s11   ;;  %s480_s10 = sphi %s505_s10, %s667_s10   ;;  %s476_s9 = sphi %s503_s9, %s666_s9   ;;  %s472_s8 = sphi %s501_s8, %s665_s8   ;;  %s468_s7 = sphi %s499_s7, %s664_s7   ;;  %s464_s6 = sphi %s497_s6, %s663_s6  }
   0x5   : > { %p35_p0 = scmp.ge.s32.totalorder %s33_s13, 2  ;;  %s44_s14 = sadd.s32 1, %s472_s8 }
   0x6   : > { %p51_p1 = scmp.ne.s32.totalorder %s472_s8, %s468_s7  ;;  %p52_p2 = scmp.eq.s32.totalorder %s484_s11, 0 }
   0x7   : > { %s669_s13 = smov (%p35_p0, %s33_s13), 0  ;;  %p57_p4 = scmp.ne.s32.totalorder %s468_s7, %s464_s6 }
   0x8   : > { %p533_p3 = por %p52_p2, %p51_p1  ;;  %s37_s16 = ssub.s32 %s480_s10, %s669_s13 }
   0x9   : > { %p58_p5 = scmp.eq.s32.totalorder %s335_s12, 0  ;;  %p42_p6 = scmp.eq.s32.totalorder %s37_s16, 0 }
   0xa   : > { %p354_p8 = scmp.lt.s32.totalorder %s484_s11, 2  ;;  %s111_s19 = sand.u32 1, %s472_s8  }
   0xb   : > { %p540_p7 = por %p58_p5, %p57_p4  ;;  %s340_s20 = sshll.u32 %s480_s10, 7 }
   0xc   : > { %s546_s18 = scalar_select %p42_p6, %s472_s8, %s44_s14  }
   0xd   : > { %s339_s21 = sshll.u32 %s111_s19, 3  ;;  %s553_s24 = scalar_lea.hbm %s656_s0, %s340_s20 }
   0xe   : > { %s115_s25 = scalar_lea.vmem [#allocation2], %s339_s21  ;;  %p557_p9 = pnand %p354_p8, %p533_p3 }
   0xf   : > { %s124_s26 = sshll.u32 %s115_s25, 4  ;;  %s112_s28 = scalar_lea.sflag [#allocation3], %s111_s19  ;;  %s561_s26 = int_to_ptr.vmem [resolvable:$true] %s124_s26 }
  0x10   : > { %s404_s29 = scalar_lea.hbm %s553_s24, 128  ;;  %p406_p13 = pneg %p557_p9 }
  0x11   : > { %p405_p12 = scmp.ne.s32.totalorder %s553_s24, %s404_s29  ;;  %s409_s3 = scalar_lea.hbm %s656_s0, 256 }
  0x12   : > { %p410_p2 = scmp.lt.u32.totalorder %s553_s24, %s656_s0  ;;  %p411_p3 = scmp.lt.u32.totalorder %s409_s3, %s404_s29 }
  0x13   : > { %p407_p0 = pnand %p406_p13, %p405_p12  ;;  %p413_p5 = scmp.lt.u32.totalorder %s404_s29, %s553_s24 }
  0x14   : > { %p412_p4 = por %p411_p3, %p410_p2 }
  0x15   : > { %p408_p1 = pneg %p407_p0 }
  0x16   : > { %p414_p6 = por %p413_p5, %p412_p4 }
  0x18   : > { %p415_p8 = pnand %p414_p6, %p408_p1 }
  0x1a   : > { %418 = shalt.err (!%p415_p8)
}
  0x1b   : > { %s419_s6 = scalar_lea.vmem %s561_s26, 128  ;;  %s486_s12 = smov [#allocation2]  }
  0x1c   : > { %p420_p12 = scmp.ne.s32.totalorder %s561_s26, %s419_s6  ;;  %s424_s14 = sshll.u32 %s486_s12, 4  ;;  %s425_s14 = int_to_ptr.vmem [resolvable:$false] %s424_s14 }
  0x1d   : > { %s426_s15 = scalar_lea.vmem %s425_s14, 256  ;;  %p427_p11 = scmp.lt.s32.totalorder %s561_s26, %s425_s14 }
  0x1e   : > { %p422_p0 = pnand %p420_p12, %p406_p13  ;;  %p428_p2 = scmp.lt.s32.totalorder %s426_s15, %s419_s6 }
  0x20   : > { %p423_p10 = pneg %p422_p0  ;;  %p429_p3 = por %p428_p2, %p427_p11 }
  0x22   : > { %p430_p4 = pnand %p429_p3, %p423_p10 }
  0x24   : > { %433 = shalt.err (!%p430_p4)
}
  0x25   : > { %353 = dma.hbm_to_vmem [thread:$0]  (!%p557_p9), %s553_s24, 128, %s561_s26, %s112_s28  }
  0x26   : > { %p661_p1 = scmp.lt.s32.totalorder %s484_s11, 3  ;;  %p662_p5 = scmp.ge.s32.totalorder %s484_s11, 1 }
  0x28   : > { %p130_p13 = pnand %p662_p5, %p661_p1 }
  0x29   : > { %s135_s16 = sand.u32 (!%p130_p13), 1, %s468_s7  }
  0x2a   : > { %133 = sbr.rel (%p130_p13) target bundleno = 241 (0xf1), region = 24  ;;  %s342_s19 = sshll.u32 (!%p130_p13), %s135_s16, 3 }
  0x2b   : > { %s136_s20 = scalar_lea.sflag (!%p130_p13), [#allocation3], %s135_s16  ;;  %s139_s21 = scalar_lea.vmem (!%p130_p13), [#allocation2], %s342_s19 }
  0x31   : > { %459 = dma.done.wait (%p540_p7), %s136_s20, 128  }
  0x32   : > { %461 = vsyncadd (%p540_p7), %s136_s20, 4294967168  ;;  %v178_v0 = vld [vmem:[%s139_s21] sm:$0xff]  ;;  %p166_p9 = scmp.lt.s32.totalorder %s476_s9, 1  ;;  %vm211_vm0 = vcmask 64512  }
  0x33   : > { %179 = vxpose.xlu0.b32.start.end [1/1] (short) %v178_v0, 128 }
  0x34   : > { %s671_s9 = smov (!%p166_p9, %s476_s9), 1 }
  0x35   : > { %s347_s22 = sshll.u32 %s671_s9, 7 }
  0x36   : > { %s604_s25 = scalar_lea.vmem %s657_s1, %s347_s22 }
  0xb3   : > { %v195_v1 = vpop.trf.xlu0 }
  0xb4   : > { %212 = vst.msk [vmem:[%s604_s25] sm:$0xff] %vm211_vm0, %v195_v1 }
  0xb7   : > { %v196_v2 = vpop.trf.xlu0 }
  0xb8   : > { %213 = vst.msk [vmem:[%s604_s25 + $0x8] sm:$0xff] %vm211_vm0, %v196_v2 }
  0xbb   : > { %v197_v3 = vpop.trf.xlu0 }
  0xbc   : > { %214 = vst.msk [vmem:[%s604_s25 + $0x10] sm:$0xff] %vm211_vm0, %v197_v3 }
  0xbf   : > { %v198_v4 = vpop.trf.xlu0 }
  0xc0   : > { %215 = vst.msk [vmem:[%s604_s25 + $0x18] sm:$0xff] %vm211_vm0, %v198_v4 }
  0xc3   : > { %v199_v5 = vpop.trf.xlu0 }
  0xc4   : > { %216 = vst.msk [vmem:[%s604_s25 + $0x20] sm:$0xff] %vm211_vm0, %v199_v5 }
  0xc7   : > { %v200_v6 = vpop.trf.xlu0 }
  0xc8   : > { %217 = vst.msk [vmem:[%s604_s25 + $0x28] sm:$0xff] %vm211_vm0, %v200_v6 }
  0xcb   : > { %v201_v7 = vpop.trf.xlu0 }
  0xcc   : > { %218 = vst.msk [vmem:[%s604_s25 + $0x30] sm:$0xff] %vm211_vm0, %v201_v7 }
  0xcf   : > { %v202_v8 = vpop.trf.xlu0 }
  0xd0   : > { %219 = vst.msk [vmem:[%s604_s25 + $0x38] sm:$0xff] %vm211_vm0, %v202_v8 }
  0xd3   : > { %v203_v9 = vpop.trf.xlu0 }
  0xd4   : > { %220 = vst.msk [vmem:[%s604_s25 + $0x40] sm:$0xff] %vm211_vm0, %v203_v9 }
  0xd7   : > { %v204_v10 = vpop.trf.xlu0 }
  0xd8   : > { %221 = vst.msk [vmem:[%s604_s25 + $0x48] sm:$0xff] %vm211_vm0, %v204_v10 }
  0xdb   : > { %v205_v11 = vpop.trf.xlu0 }
  0xdc   : > { %222 = vst.msk [vmem:[%s604_s25 + $0x50] sm:$0xff] %vm211_vm0, %v205_v11 }
  0xdf   : > { %v206_v12 = vpop.trf.xlu0 }
  0xe0   : > { %223 = vst.msk [vmem:[%s604_s25 + $0x58] sm:$0xff] %vm211_vm0, %v206_v12 }
  0xe3   : > { %v207_v13 = vpop.trf.xlu0 }
  0xe4   : > { %224 = vst.msk [vmem:[%s604_s25 + $0x60] sm:$0xff] %vm211_vm0, %v207_v13 }
  0xe7   : > { %v208_v14 = vpop.trf.xlu0 }
  0xe8   : > { %225 = vst.msk [vmem:[%s604_s25 + $0x68] sm:$0xff] %vm211_vm0, %v208_v14 }
  0xeb   : > { %v209_v15 = vpop.trf.xlu0 }
  0xec   : > { %226 = vst.msk [vmem:[%s604_s25 + $0x70] sm:$0xff] %vm211_vm0, %v209_v15 }
  0xef   : > { %v210_v16 = vpop.trf.xlu0 }
  0xf0   : > { %227 = vst.msk [vmem:[%s604_s25 + $0x78] sm:$0xff] %vm211_vm0, %v210_v16 }
  0xf1 PF: > { %s14_s11 = sadd.s32 1, %s484_s11   ;;  %s663_s6 = smov %s468_s7 }
  0xf2   : > { %p11_p7 = scmp.ge.s32.totalorder %s14_s11, 4   ;;  %s664_s7 = smov %s472_s8 }
  0xf3   : > { %s665_s8 = smov %s546_s18  ;;  %s666_s9 = smov %s480_s10 }
  0xf4   : > { %s667_s10 = smov %s669_s13  ;;  %13 = sbr.rel (!%p11_p7) target bundleno = 4 (0x4), region = 64 }
  0xfb   :  { %264 = vsyncpa [#allocation3], 1 }
  0xfc   :  { %266 = vsyncpa [#allocation3 + $0x1], 1 }

</bundles_post_ra>
